<compile_context>
chip_gen: v7x
topology: tpu7x:2x2x1
jax: 0.10.0
libtpu: 0.0.40
codegen_flags: <defaults>
</compile_context>

<pallas_src>
import jax
import jax.numpy as jnp
import numpy as np
from jax.experimental import pallas as pl
from jax.experimental.pallas import tpu as pltpu

KERNEL_SIZE = 3  # self.cnn_filter_size in the reference module


# ------------------------------ tiling helpers ------------------------------
def _round_up(x, m):
    return ((x + m - 1) // m) * m


def _choose_batch_tile(B_eff, S, H, in_itemsize, *, resident_bytes=0,
                       vmem_target_bytes=28 * 1024 * 1024):
    """Pick rows-per-grid-step (TB) and a matching vmem_limit_bytes.

    TB is bounded by:
      * the VMEM budget: 2 double-buffered (TB,S,H) input blocks + 2 (TB,H)
        output blocks + ~(K+2) H-wide f32 temporaries + resident constants,
        targeted at ~28 MiB so it fits every generation's scoped VMEM once the
        limit is raised (and stays well under v7x's 64 MiB physical);
      * a megacore constraint: grid >= 2 (>= 4 for larger batches) so both
        v7x TensorCores stream and compute;
      * the batch itself (block must not exceed the array's batch extent,
        rounded down to a sublane multiple of 8).
    """
    per_row = (2 * S * H * in_itemsize            # input block, double-buffered
               + 2 * H * in_itemsize              # output block, double-buffered
               + (KERNEL_SIZE + 2) * H * 4)       # in-kernel f32 temporaries
    avail = max(vmem_target_bytes - resident_bytes, 8 * per_row)
    tb_budget = min(512, max(8, (avail // per_row) // 8 * 8))

    if B_eff >= 32:
        tb_grid = _round_up(pl.cdiv(B_eff, 4), 8)   # >= 4 grid steps
    elif B_eff >= 16:
        tb_grid = _round_up(pl.cdiv(B_eff, 2), 8)   # >= 2 grid steps
    else:
        tb_grid = 8                                 # can't split below a sublane

    tb = max(8, min(tb_budget, tb_grid, (B_eff // 8) * 8))

    need = resident_bytes + per_row * tb
    vmem_limit = int(max(32 << 20, min(need + (6 << 20), 48 << 20)))
    return tb, vmem_limit


# ----------------------------- CNN pooling ----------------------------------
def _cnn_pool_kernel(x_ref, w_ref, b_ref, o_ref):
    # x_ref: (TB, S, H)  token-set embeddings, channels-last
    # w_ref: (K*H, H)    fused conv weight pre-scaled by 1/L:
    #                    w[k*H + i, o] = weight[o, i, k] / L
    # b_ref: (1, H)      conv bias (f32)
    # o_ref: (TB, H)     pooled output rows
    x = x_ref[...]
    TB, S, H = x.shape
    K = w_ref.shape[0] // H
    L = S - K + 1  # valid-conv output length

    # mean_t Conv1d(x)[t] == sum_k window_k @ (W_k / L) + b, with
    # window_k = sum_{t=k}^{k+L-1} x[:, t, :].
    # Compute windows as "full sum minus excluded edge rows": one sublane
    # reduce + K*(K-1) static single-row subtracts (no masked selects).
    xf = x.astype(jnp.float32)
    full = xf.sum(axis=1)                          # (TB, H)
    windows = []
    for k in range(K):                             # static, unrolled (K == 3)
        w = full
        for t in range(k):                         # excluded leading rows
            w = w - xf[:, t, :]
        for t in range(k + L, S):                  # excluded trailing rows
            w = w - xf[:, t, :]
        windows.append(w)
    z = jnp.concatenate(windows, axis=-1)          # (TB, K*H)

    # Single MXU matmul for the whole tile; bf16 operands when the stream is
    # bf16 upstream (w_ref carries that dtype), f32 accumulation either way.
    out = jnp.dot(z.astype(w_ref.dtype), w_ref[...],
                  preferred_element_type=jnp.float32)
    o_ref[...] = (out + b_ref[...]).astype(o_ref.dtype)


def cnn_set_pool(inputs, weight, bias):
    """hidden = Conv1d(H, H, K)(inputs.transpose(1, 2)).mean(-1)"""
    B, S, H = inputs.shape
    H_out, H_in, K = weight.shape
    if H_in != H:
        raise ValueError("conv in-channels must match hidden size")
    if S < K:
        raise ValueError(f"set size {S} must be >= cnn filter size {K}")
    L = S - K + 1

    x = inputs
    if B < 8:  # only tiny batches get padded (<= 7 rows), never a full pass
        x = jnp.pad(x, ((0, 8 - B), (0, 0), (0, 0)))
    B_eff = x.shape[0]

    # fused weight: w_fused[k*H_in + i, o] = weight[o, i, k] / L
    w_dtype = jnp.bfloat16 if inputs.dtype == jnp.bfloat16 else jnp.float32
    w_fused = (jnp.transpose(weight, (2, 1, 0)).reshape(K * H_in, H_out)
               .astype(jnp.float32) * (1.0 / L)).astype(w_dtype)
    b_2d = bias.reshape(1, H_out).astype(jnp.float32)

    resident = 2 * (w_fused.size * w_fused.dtype.itemsize + b_2d.size * 4)
    TB, vmem_limit = _choose_batch_tile(B_eff, S, H, x.dtype.itemsize,
                                        resident_bytes=resident)
    grid = pl.cdiv(B_eff, TB)  # ragged last block allowed

    out = pl.pallas_call(
        _cnn_pool_kernel,
        out_shape=jax.ShapeDtypeStruct((B_eff, H_out), inputs.dtype),
        grid_spec=pltpu.PrefetchScalarGridSpec(
            num_scalar_prefetch=0,
            grid=(grid,),
            in_specs=[
                pl.BlockSpec((TB, S, H), lambda i: (i, 0, 0)),
                # constant-index blocks -> stay VMEM-resident across steps
                pl.BlockSpec((K * H_in, H_out), lambda i: (0, 0)),
                pl.BlockSpec((1, H_out), lambda i: (0, 0)),
            ],
            out_specs=pl.BlockSpec((TB, H_out), lambda i: (i, 0)),
        ),
        compiler_params=pltpu.CompilerParams(
            dimension_semantics=("parallel",),
            vmem_limit_bytes=vmem_limit),
    )(x, w_fused, b_2d)
    return out[:B]


# ----------------------------- mean pooling ----------------------------------
def _mean_pool_kernel(x_ref, inv_ref, o_ref):
    # x_ref: (TB, S, H); inv_ref: (TB, 1) or (TB, H) reciprocal mask sums
    s = x_ref[...].astype(jnp.float32).sum(axis=1)            # (TB, H)
    o_ref[...] = (s * inv_ref[...]).astype(o_ref.dtype)       # VPU broadcast mul


def mean_set_pool(inputs, attention_mask):
    """hidden = inputs.sum(1) / attention_mask.sum(1)"""
    B, S, H = inputs.shape

    # Denominator matches the reference exactly: attention_mask.sum(1),
    # broadcast against (B, H).  Rows whose mask sums to zero produce inf/nan,
    # same as the PyTorch module.  Reciprocal is taken once here so the kernel
    # only multiplies.
    denom = attention_mask.astype(jnp.float32).sum(axis=1).reshape(B, -1)
    if denom.shape[1] not in (1, H):
        raise ValueError("attention_mask.sum(1) must broadcast against (B, H)")
    inv = 1.0 / denom                                          # (B, 1) or (B, H)

    x = inputs
    if B < 8:
        x = jnp.pad(x, ((0, 8 - B), (0, 0), (0, 0)))
        inv = jnp.pad(inv, ((0, 8 - B), (0, 0)), constant_values=1.0)
    B_eff = x.shape[0]
    C = inv.shape[1]

    TB, vmem_limit = _choose_batch_tile(B_eff, S, H, x.dtype.itemsize)
    grid = pl.cdiv(B_eff, TB)

    out = pl.pallas_call(
        _mean_pool_kernel,
        out_shape=jax.ShapeDtypeStruct((B_eff, H), inputs.dtype),
        grid_spec=pltpu.PrefetchScalarGridSpec(
            num_scalar_prefetch=0,
            grid=(grid,),
            in_specs=[
                pl.BlockSpec((TB, S, H), lambda i: (i, 0, 0)),
                pl.BlockSpec((TB, C), lambda i: (i, 0)),
            ],
            out_specs=pl.BlockSpec((TB, H), lambda i: (i, 0)),
        ),
        compiler_params=pltpu.CompilerParams(
            dimension_semantics=("parallel",),
            vmem_limit_bytes=vmem_limit),
    )(x, inv)
    return out[:B]


# ------------------------------ module port ---------------------------------
class SetPooler:
    """JAX/Pallas port of the SetSUMBT SetPooler forward pass."""

    def __init__(self, pooling_strategy="cnn", hidden_size=128, key=None):
        self.pooling_strategy = pooling_strategy
        self.hidden_size = hidden_size
        if pooling_strategy == "cnn":
            key = jax.random.PRNGKey(0) if key is None else key
            kw, kb = jax.random.split(key)
            # Deterministic Conv1d-style init: U(-1/sqrt(fan_in), 1/sqrt(fan_in))
            fan_in = hidden_size * KERNEL_SIZE
            bound = 1.0 / np.sqrt(fan_in)
            self.weight = jax.random.uniform(
                kw, (hidden_size, hidden_size, KERNEL_SIZE),
                minval=-bound, maxval=bound, dtype=jnp.float32)  # (out, in, K)
            self.bias = jax.random.uniform(
                kb, (hidden_size,), minval=-bound, maxval=bound,
                dtype=jnp.float32)
        elif pooling_strategy == "dan":
            # TODO(synk): 'dan' Sequential(Linear(H,H), GELU, Linear(2H,H)) has a shape
            # mismatch in the reference code and cannot execute; not implemented.
            raise NotImplementedError("dan pooling is broken in the reference module")

    def __call__(self, inputs, attention_mask):
        if self.pooling_strategy == "mean":
            return mean_set_pool(inputs, attention_mask)
        elif self.pooling_strategy == "cnn":
            return cnn_set_pool(inputs, self.weight, self.bias)
        raise NotImplementedError(self.pooling_strategy)


if __name__ == "__main__":
    B, S, H = 2, 8, 128
    key = jax.random.PRNGKey(0)
    k_x, k_m, k_p = jax.random.split(key, 3)

    inputs = jax.random.normal(k_x, (B, S, H), dtype=jnp.float32)
    attention_mask = jnp.ones((B, S, 1), dtype=jnp.float32)

    # --- CNN strategy (module default) ---
    pooler = SetPooler(pooling_strategy="cnn", hidden_size=H, key=k_p)
    out_cnn = pooler(inputs, attention_mask)
    jax.block_until_ready(out_cnn)

    # Pure-JAX reference: valid Conv1d over the token axis, then mean over positions.
    L = S - KERNEL_SIZE + 1
    windows = jnp.stack([inputs[:, k:k + L, :] for k in range(KERNEL_SIZE)],
                        axis=-1)                                   # (B, L, H_in, K)
    ref_cnn = jnp.einsum("blik,oik->bo", windows, pooler.weight,
                         precision=jax.lax.Precision.HIGHEST) / L + pooler.bias
    # The kernel reassociates the f32 accumulation (sum-over-positions first,
    # full-minus-edge windows), so allow a slightly looser-than-ulp tolerance.
    np.testing.assert_allclose(np.asarray(out_cnn), np.asarray(ref_cnn),
                               rtol=1e-4, atol=1e-5)

    # --- mean strategy ---
    mean_pooler = SetPooler(pooling_strategy="mean", hidden_size=H)
    out_mean = mean_pooler(inputs, attention_mask)
    jax.block_until_ready(out_mean)
    ref_mean = inputs.sum(axis=1) / attention_mask.sum(axis=1)
    np.testing.assert_allclose(np.asarray(out_mean), np.asarray(ref_mean),
                               rtol=1e-4, atol=1e-6)

    print("KERNEL_OK")
</pallas_src>

<mosaic_0001>
module attributes {stable_mosaic.version = 11 : i64} {
  func.func @_cnn_pool_kernel(%arg0: i32, %arg1: memref<8x8x128xf32, #tpu.memory_space<vmem>>, %arg2: memref<384x128xf32, #tpu.memory_space<vmem>>, %arg3: memref<1x128xf32, #tpu.memory_space<vmem>>, %arg4: memref<8x128xf32, #tpu.memory_space<vmem>>) attributes {dimension_semantics = [#tpu.dimension_semantics<parallel>], iteration_bounds = array<i64: 1>, scalar_prefetch = 0 : i64, scratch_operands = 0 : i64, tpu.core_type = #tpu.core_type<tc>, window_params = [{transform_indices = @transform_0, window_bounds = array<i64: 8, 8, 128>}, {pipeline_mode = #tpu.pipeline_mode<synchronous>, transform_indices = @transform_1, window_bounds = array<i64: 384, 128>}, {pipeline_mode = #tpu.pipeline_mode<synchronous>, transform_indices = @transform_2, window_bounds = array<i64: 1, 128>}, {transform_indices = @transform_3, window_bounds = array<i64: 8, 128>}]} {
    %c0 = arith.constant 0 : index
    %c0_0 = arith.constant 0 : index
    %c0_1 = arith.constant 0 : index
    %0 = vector.load %arg1[%c0, %c0_0, %c0_1] : memref<8x8x128xf32, #tpu.memory_space<vmem>>, vector<8x8x128xf32>
    %cst = arith.constant dense<0.000000e+00> : vector<8x128xf32>
    %1 = vector.multi_reduction <add>, %0, %cst [1] : vector<8x8x128xf32> to vector<8x128xf32>
    %2 = vector.extract_strided_slice %0 {offsets = [0, 6, 0], sizes = [8, 1, 128], strides = [1, 1, 1]} : vector<8x8x128xf32> to vector<8x1x128xf32>
    %3 = vector.shape_cast %2 : vector<8x1x128xf32> to vector<8x128xf32>
    %4 = arith.subf %1, %3 : vector<8x128xf32>
    %5 = vector.extract_strided_slice %0 {offsets = [0, 7, 0], sizes = [8, 1, 128], strides = [1, 1, 1]} : vector<8x8x128xf32> to vector<8x1x128xf32>
    %6 = vector.shape_cast %5 : vector<8x1x128xf32> to vector<8x128xf32>
    %7 = arith.subf %4, %6 : vector<8x128xf32>
    %8 = vector.extract_strided_slice %0 {offsets = [0, 0, 0], sizes = [8, 1, 128], strides = [1, 1, 1]} : vector<8x8x128xf32> to vector<8x1x128xf32>
    %9 = vector.shape_cast %8 : vector<8x1x128xf32> to vector<8x128xf32>
    %10 = arith.subf %1, %9 : vector<8x128xf32>
    %11 = vector.extract_strided_slice %0 {offsets = [0, 7, 0], sizes = [8, 1, 128], strides = [1, 1, 1]} : vector<8x8x128xf32> to vector<8x1x128xf32>
    %12 = vector.shape_cast %11 : vector<8x1x128xf32> to vector<8x128xf32>
    %13 = arith.subf %10, %12 : vector<8x128xf32>
    %14 = vector.extract_strided_slice %0 {offsets = [0, 0, 0], sizes = [8, 1, 128], strides = [1, 1, 1]} : vector<8x8x128xf32> to vector<8x1x128xf32>
    %15 = vector.shape_cast %14 : vector<8x1x128xf32> to vector<8x128xf32>
    %16 = arith.subf %1, %15 : vector<8x128xf32>
    %17 = vector.extract_strided_slice %0 {offsets = [0, 1, 0], sizes = [8, 1, 128], strides = [1, 1, 1]} : vector<8x8x128xf32> to vector<8x1x128xf32>
    %18 = vector.shape_cast %17 : vector<8x1x128xf32> to vector<8x128xf32>
    %19 = arith.subf %16, %18 : vector<8x128xf32>
    %20 = tpu.concatenate %7, %13, %19 in 1 : vector<8x128xf32>, vector<8x128xf32>, vector<8x128xf32> -> vector<8x384xf32>
    %c0_2 = arith.constant 0 : index
    %c0_3 = arith.constant 0 : index
    %21 = vector.load %arg2[%c0_2, %c0_3] : memref<384x128xf32, #tpu.memory_space<vmem>>, vector<384x128xf32>
    %cst_4 = arith.constant dense<0.000000e+00> : vector<8x128xf32>
    %22 = tpu.matmul %20, %21, %cst_4 {dimension_numbers = #tpu.dot_dimension_numbers<[1], [0], [0], [1], [0, 0, 1, 1], [], []>} : vector<8x384xf32>, vector<384x128xf32>, vector<8x128xf32> -> vector<8x128xf32>
    %c0_5 = arith.constant 0 : index
    %c0_6 = arith.constant 0 : index
    %23 = vector.load %arg3[%c0_5, %c0_6] : memref<1x128xf32, #tpu.memory_space<vmem>>, vector<1x128xf32>
    %24 = vector.broadcast %23 : vector<1x128xf32> to vector<8x128xf32>
    %25 = arith.addf %22, %24 : vector<8x128xf32>
    %c0_7 = arith.constant 0 : index
    %c0_8 = arith.constant 0 : index
    %26 = vector.load %arg4[%c0_7, %c0_8] : memref<8x128xf32, #tpu.memory_space<vmem>>, vector<8x128xf32>
    tpu.vector_store %arg4[%c0_7, %c0_8], %25 {strides = array<i32>} : memref<8x128xf32, #tpu.memory_space<vmem>>, vector<8x128xf32>,
    return
  }
  func.func @transform_0(%arg0: i32) -> (i32, i32, i32) {
    %c0_i32 = arith.constant 0 : i32
    %c0_i32_0 = arith.constant 0 : i32
    %c0_i32_1 = arith.constant 0 : i32
    return %arg0, %c0_i32, %c0_i32_0 : i32, i32, i32
  }
  func.func @transform_1(%arg0: i32) -> (i32, i32) {
    %c0_i32 = arith.constant 0 : i32
    %c0_i32_0 = arith.constant 0 : i32
    %c0_i32_1 = arith.constant 0 : i32
    return %c0_i32, %c0_i32_0 : i32, i32
  }
  func.func @transform_2(%arg0: i32) -> (i32, i32) {
    %c0_i32 = arith.constant 0 : i32
    %c0_i32_0 = arith.constant 0 : i32
    %c0_i32_1 = arith.constant 0 : i32
    return %c0_i32, %c0_i32_0 : i32, i32
  }
  func.func @transform_3(%arg0: i32) -> (i32, i32) {
    %c0_i32 = arith.constant 0 : i32
    %c0_i32_0 = arith.constant 0 : i32
    return %arg0, %c0_i32 : i32, i32
  }
}

</mosaic_0001>

<bundles_post_ra>
// kernel: tpu_custom_call.1
= control target key start
LH: loop header
LB: loop body
LE: loop exit
PB: predicated region body
PF: predicated region fallthrough
CT: control target
= control target key end

     0   :  { %8 = vsyncpa [#allocation3], 0  ;;  %s899_s0 = inlined_call_operand.hbm [shape: f32[8,8,128], index: 0, kind: input, shape index: {}]   ;;  %s900_s1 = inlined_call_operand.hbm [shape: f32[384,128], index: 1, kind: input, shape index: {}]   ;;  %s901_s2 = inlined_call_operand.vmem [shape: f32[1,128], index: 2, kind: input, shape index: {}]   ;;  %s902_s3 = inlined_call_operand.hbm [shape: f32[8,128], index: 3, kind: output, shape index: {}]  }
   0x1   :  { %9 = vsyncpa [#allocation6], 0 }
   0x2   :  { %10 = vsyncpa [#allocation4], 0  ;;  %s673_s12 = smov [#allocation2]   ;;  %s601_s16 = scalar_lea.hbm %s899_s0, 1024 }
   0x3   :  { %s16_s13 = sshll.u32 %s673_s12, 4  ;;  %p602_p0 = scmp.ne.s32.totalorder %s899_s0, %s601_s16  ;;  %s17_s13 = int_to_ptr.vmem [resolvable:$true] %s16_s13 }
   0x4   :  { %p605_p1 = scmp.lt.u32.totalorder %s601_s16, %s899_s0 }
   0x6   :  { %p607_p2 = pnand %p605_p1, %p602_p0 }
   0x8   :  { %610 = shalt.err (!%p607_p2)
}
   0x9   :  { %s611_s21 = scalar_lea.vmem %s17_s13, 1024  ;;  %p616_p4 = scmp.lt.s32.totalorder %s17_s13, %s17_s13 }
   0xa   :  { %p612_p3 = scmp.ne.s32.totalorder %s17_s13, %s611_s21  ;;  %p617_p5 = scmp.lt.s32.totalorder %s611_s21, %s611_s21 }
   0xc   :  { %p618_p6 = por %p617_p5, %p616_p4 }
   0xe   :  { %p619_p7 = pnand %p618_p6, %p612_p3 }
  0x10   :  { %622 = shalt.err (!%p619_p7)
}
  0x11   :  { %s674_s22 = smov 128   ;;  %s675_s23 = smov 8  }
  0x12   :  { %22 = dma.hbm_to_vmem [thread:$0]  %s899_s0, 1024, %s17_s13, [#allocation3], %s674_s22, %s674_s22, %s675_s23  }
  0x13   :  { %s676_s26 = smov [#allocation5]   ;;  %s623_s30 = scalar_lea.hbm %s900_s1, 6144 }
  0x14   :  { %s28_s27 = sshll.u32 %s676_s26, 4  ;;  %p624_p8 = scmp.ne.s32.totalorder %s900_s1, %s623_s30  ;;  %s29_s27 = int_to_ptr.vmem [resolvable:$true] %s28_s27 }
  0x15   :  { %p627_p9 = scmp.lt.u32.totalorder %s623_s30, %s900_s1 }
  0x17   :  { %p629_p10 = pnand %p627_p9, %p624_p8 }
  0x19   :  { %632 = shalt.err (!%p629_p10)
}
  0x1a   :  { %s633_s8 = scalar_lea.vmem %s29_s27, 6144  ;;  %p638_p12 = scmp.lt.s32.totalorder %s29_s27, %s29_s27 }
  0x1b   :  { %p634_p11 = scmp.ne.s32.totalorder %s29_s27, %s633_s8  ;;  %p639_p13 = scmp.lt.s32.totalorder %s633_s8, %s633_s8 }
  0x1d   :  { %p640_p0 = por %p639_p13, %p638_p12 }
  0x1f   :  { %p641_p1 = pnand %p640_p0, %p634_p11 }
  0x21   :  { %644 = shalt.err (!%p641_p1)
}
  0x22   :  { %34 = dma.hbm_to_vmem [thread:$0]  %s900_s1, 6144, %s29_s27, [#allocation6], %s674_s22, %s674_s22, %s675_s23  }
  0x23   :  { %667 = dma.done.wait [#allocation3], 1024  }
  0x24   :  { %668 = vsyncadd [#allocation3], 4294966272 }
  0x25   :  { %669 = dma.done.wait [#allocation6], 6144  }
  0x26   :  { %670 = vsyncadd [#allocation6], 4294961152  ;;  %v677_v0 = vmov 0.0|0.0   ;;  %vm678_vm0 = vmmov 0   ;;  %v679_v1 = vmov 0.0   ;;  %v240_v2 = vld [vmem:[#allocation5 + $0x80] sm:$0xff] }
  0x27   :  { %569 = vmatprep.subr.bf16.mxu1 %v677_v0  ;;  %534 = vmatprep.mubr.msk.f32.mxu1 %vm678_vm0, %v679_v1  ;;  %v241_v3 = vld [vmem:[#allocation5 + $0x88] sm:$0xff]  ;;  %v224_v4 = vld [vmem:[#allocation5] sm:$0xff]  ;;  %v242_v7 = vld [vmem:[#allocation5 + $0x90] sm:$0xff]  ;;  %vm172_vm1 = vcmask 1047559   ;;  %vm176_vm2 = vcmask 1041409   ;;  %vm179_vm3 = vcmask 1042434  }
  0x28   :  { %v537_v5 = vpack.c.bf16 %v241_v3, %v240_v2  ;;  %v225_v6 = vld [vmem:[#allocation5 + $0x8] sm:$0xff]  ;;  %v243_v8 = vld [vmem:[#allocation5 + $0x98] sm:$0xff]  ;;  %v226_v11 = vld [vmem:[#allocation5 + $0x10] sm:$0xff]  ;;  %vm182_vm4 = vcmask 1043459   ;;  %vm185_vm5 = vcmask 1044484   ;;  %vm188_vm6 = vcmask 1045509  }
  0x29   :  { %v539_v9 = vpack.c.bf16 %v225_v6, %v224_v4  ;;  %v541_v10 = vpack.c.bf16 %v243_v8, %v242_v7  ;;  %v227_v12 = vld [vmem:[#allocation5 + $0x18] sm:$0xff]  ;;  %v256_v13 = vld [vmem:[#allocation5 + $0x100] sm:$0xff]  ;;  %v257_v14 = vld [vmem:[#allocation5 + $0x108] sm:$0xff]  ;;  %vm279_vm7 = vcmask 1041408   ;;  %s680_s11 = smov [#allocation7]  }
  0x2a   :  { %538 = vmatprep.subr.bf16.mxu0 %v537_v5  ;;  %v244_v15 = vld [vmem:[#allocation5 + $0xa0] sm:$0xff]  ;;  %v245_v16 = vld [vmem:[#allocation5 + $0xa8] sm:$0xff]  ;;  %v543_v17 = vpack.c.bf16 %v227_v12, %v226_v11  ;;  %v570_v18 = vpack.c.bf16 %v257_v14, %v256_v13  ;;  %v258_v19 = vld [vmem:[#allocation5 + $0x110] sm:$0xff]  ;;  %s439_s12 = sshll.u32 %s680_s11, 4  ;;  %s440_s12 = int_to_ptr.vmem [resolvable:$true] %s439_s12 }
  0x2b   :  { %540 = vmatpush3.bf16.msra.mxu0 %v539_v9  ;;  %v545_v20 = vpack.c.bf16 %v245_v16, %v244_v15  ;;  %v228_v21 = vld [vmem:[#allocation5 + $0x20] sm:$0xff]  ;;  %v229_v22 = vld [vmem:[#allocation5 + $0x28] sm:$0xff]  ;;  %v259_v23 = vld [vmem:[#allocation5 + $0x118] sm:$0xff]  ;;  %s645_s13 = scalar_lea.vmem %s440_s12, 128  ;;  %p650_p3 = scmp.lt.s32.totalorder %s440_s12, %s440_s12 }
  0x2c   :  { %542 = vmatprep.subr.bf16.mxu0 %v541_v10  ;;  %571 = vmatpush3.bf16.msra.mxu1 %v570_v18  ;;  %v573_v24 = vpack.c.bf16 %v259_v23, %v258_v19  ;;  %v246_v25 = vld [vmem:[#allocation5 + $0xb0] sm:$0xff]  ;;  %v247_v26 = vld [vmem:[#allocation5 + $0xb8] sm:$0xff]  ;;  %v260_v29 = vld [vmem:[#allocation5 + $0x120] sm:$0xff]  ;;  %v547_v31 = vpack.c.bf16 %v229_v22, %v228_v21  ;;  %p646_p2 = scmp.ne.s32.totalorder %s440_s12, %s645_s13  ;;  %p651_p4 = scmp.lt.s32.totalorder %s645_s13, %s645_s13 }
  0x2d   :  { %572 = vmatprep.subr.bf16.mxu1 %v677_v0  ;;  %v230_v27 = vld [vmem:[#allocation5 + $0x30] sm:$0xff]  ;;  %v231_v28 = vld [vmem:[#allocation5 + $0x38] sm:$0xff]  ;;  %v261_v30 = vld [vmem:[#allocation5 + $0x128] sm:$0xff]  ;;  %v549_v36 = vpack.c.bf16 %v247_v26, %v246_v25 }
  0x2e   :  { %v248_v32 = vld [vmem:[#allocation5 + $0xc0] sm:$0xff]  ;;  %v249_v33 = vld [vmem:[#allocation5 + $0xc8] sm:$0xff]  ;;  %v262_v37 = vld [vmem:[#allocation5 + $0x130] sm:$0xff]  ;;  %v576_v41 = vpack.c.bf16 %v261_v30, %v260_v29  ;;  %v551_v48 = vpack.c.bf16 %v231_v28, %v230_v27  ;;  %p652_p5 = por %p651_p4, %p650_p3 }
  0x2f   :  { %544 = vmatpush3.bf16.msra.mxu0 %v543_v17  ;;  %v727_v34 = vld [vmem:[#allocation5 + $0x40] sm:$0xff]  ;;  %v729_v35 = vld [vmem:[#allocation5 + $0x48] sm:$0xff]  ;;  %v263_v38 = vld [vmem:[#allocation5 + $0x138] sm:$0xff]  ;;  %v553_v52 = vpack.c.bf16 %v249_v33, %v248_v32 }
  0x30   :  { %546 = vmatprep.subr.bf16.mxu0 %v545_v20  ;;  %v731_v39 = vld [vmem:[#allocation5 + $0xd0] sm:$0xff]  ;;  %v733_v40 = vld [vmem:[#allocation5 + $0xd8] sm:$0xff]  ;;  %574 = vmatpush3.bf16.msra.mxu1 %v573_v24  ;;  %v739_v44 = vld [vmem:[#allocation5 + $0x140] sm:$0xff]  ;;  %v555_v53 = vpack.c.bf16 %v729_v35, %v727_v34  ;;  %v579_v57 = vpack.c.bf16 %v263_v38, %v262_v37  ;;  %p653_p6 = pnand %p652_p5, %p646_p2 }
  0x31   :  { %v735_v42 = vld [vmem:[#allocation5 + $0x50] sm:$0xff]  ;;  %v737_v43 = vld [vmem:[#allocation5 + $0x58] sm:$0xff]  ;;  %575 = vmatprep.subr.bf16.mxu1 %v677_v0  ;;  %v742_v45 = vld [vmem:[#allocation5 + $0x148] sm:$0xff]  ;;  %v557_v58 = vpack.c.bf16 %v733_v40, %v731_v39 }
  0x32   :  { %v744_v46 = vld [vmem:[#allocation5 + $0xe0] sm:$0xff]  ;;  %v746_v47 = vld [vmem:[#allocation5 + $0xe8] sm:$0xff]  ;;  %v752_v51 = vld [vmem:[#allocation5 + $0x150] sm:$0xff]  ;;  %v559_v59 = vpack.c.bf16 %v737_v43, %v735_v42  ;;  %v582_v60 = vpack.c.bf16 %v742_v45, %v739_v44 }
  0x33   :  { %548 = vmatpush3.bf16.msra.mxu0 %v547_v31  ;;  %v748_v49 = vld [vmem:[#allocation5 + $0x60] sm:$0xff]  ;;  %v750_v50 = vld [vmem:[#allocation5 + $0x68] sm:$0xff]  ;;  %v756_v54 = vld [vmem:[#allocation5 + $0x158] sm:$0xff]  ;;  %v561_v1 = vpack.c.bf16 %v746_v47, %v744_v46 }
  0x34   :  { %550 = vmatprep.subr.bf16.mxu0 %v549_v36  ;;  %v758_v55 = vld [vmem:[#allocation5 + $0xf0] sm:$0xff]  ;;  %v760_v56 = vld [vmem:[#allocation5 + $0xf8] sm:$0xff]  ;;  %577 = vmatpush3.bf16.msra.mxu1 %v576_v41  ;;  %v772_v63 = vld [vmem:[#allocation5 + $0x160] sm:$0xff]  ;;  %v563_v2 = vpack.c.bf16 %v750_v50, %v748_v49  ;;  %v585_v3 = vpack.c.bf16 %v756_v54, %v752_v51 }
  0x35   :  { %v768_v61 = vld [vmem:[#allocation5 + $0x70] sm:$0xff]  ;;  %v770_v62 = vld [vmem:[#allocation5 + $0x78] sm:$0xff]  ;;  %578 = vmatprep.subr.bf16.mxu1 %v677_v0  ;;  %v565_v4 = vpack.c.bf16 %v760_v56, %v758_v55  ;;  %v783_v5 = vld [vmem:[#allocation5 + $0x168] sm:$0xff] }
  0x36   :  { %v785_v6 = vld [vmem:[#allocation2] sm:$0xff]  ;;  %v787_v7 = vld [vmem:[#allocation2 + $0x8] sm:$0xff]  ;;  %v567_v8 = vpack.c.bf16 %v770_v62, %v768_v61  ;;  %v791_v9 = vld [vmem:[#allocation2 + $0x10] sm:$0xff]  ;;  %v588_v15 = vpack.c.bf16 %v783_v5, %v772_v63 }
  0x37   :  { %552 = vmatpush3.bf16.msra.mxu0 %v551_v48  ;;  %v793_v10 = vld [vmem:[#allocation2 + $0x18] sm:$0xff]  ;;  %v795_v11 = vld [vmem:[#allocation2 + $0x20] sm:$0xff]  ;;  %v51_v12 = vrot.slane %v785_v6, 4  ;;  %v57_v13 = vrot.slane %v787_v7, 4  ;;  %v139_v14 = vrot.slane %v785_v6, 7  ;;  %v802_v16 = vld [vmem:[#allocation2 + $0x28] sm:$0xff] }
  0x38   :  { %554 = vmatprep.subr.bf16.mxu0 %v553_v52  ;;  %v804_v17 = vld [vmem:[#allocation2 + $0x30] sm:$0xff]  ;;  %v806_v18 = vld [vmem:[#allocation2 + $0x38] sm:$0xff]  ;;  %v63_v19 = vrot.slane %v791_v9, 4  ;;  %v69_v20 = vrot.slane %v793_v10, 4  ;;  %v75_v21 = vrot.slane %v795_v11, 4  ;;  %580 = vmatpush3.bf16.msra.mxu1 %v579_v57  ;;  %v81_v24 = vrot.slane %v802_v16, 4 }
  0x39   :  { %v52_v22 = vadd.f32 %v51_v12, %v785_v6  ;;  %v58_v23 = vadd.f32 %v57_v13, %v787_v7  ;;  %v87_v25 = vrot.slane %v804_v17, 4  ;;  %581 = vmatprep.subr.bf16.mxu1 %v677_v0  ;;  %v93_v29 = vrot.slane %v806_v18, 4 }
  0x3a   :  { %v64_v26 = vadd.f32 %v63_v19, %v791_v9  ;;  %v70_v27 = vadd.f32 %v69_v20, %v793_v10  ;;  %v76_v28 = vadd.f32 %v75_v21, %v795_v11  ;;  %v82_v32 = vadd.f32 %v81_v24, %v802_v16 }
  0x3b   :  { %556 = vmatpush3.bf16.msra.mxu0 %v555_v53  ;;  %v53_v30 = vrot.slane %v52_v22, 2  ;;  %v59_v31 = vrot.slane %v58_v23, 2  ;;  %v88_v33 = vadd.f32 %v87_v25, %v804_v17  ;;  %v94_v37 = vadd.f32 %v93_v29, %v806_v18 }
  0x3c   :  { %558 = vmatprep.subr.bf16.mxu0 %v557_v58  ;;  %v65_v34 = vrot.slane %v64_v26, 2  ;;  %v71_v35 = vrot.slane %v70_v27, 2  ;;  %v77_v36 = vrot.slane %v76_v28, 2  ;;  %583 = vmatpush3.bf16.msra.mxu1 %v582_v60  ;;  %v83_v40 = vrot.slane %v82_v32, 2 }
  0x3d   :  { %v54_v38 = vadd.f32 %v53_v30, %v52_v22  ;;  %v60_v39 = vadd.f32 %v59_v31, %v58_v23  ;;  %v89_v41 = vrot.slane %v88_v33, 2  ;;  %584 = vmatprep.subr.bf16.mxu1 %v677_v0  ;;  %v95_v45 = vrot.slane %v94_v37, 2 }
  0x3e   :  { %v66_v42 = vadd.f32 %v65_v34, %v64_v26  ;;  %v72_v43 = vadd.f32 %v71_v35, %v70_v27  ;;  %v78_v44 = vadd.f32 %v77_v36, %v76_v28  ;;  %v84_v48 = vadd.f32 %v83_v40, %v82_v32 }
  0x3f   :  { %560 = vmatpush3.bf16.msra.mxu0 %v559_v59  ;;  %v55_v46 = vrot.slane %v54_v38, 1  ;;  %v61_v47 = vrot.slane %v60_v39, 1  ;;  %v90_v51 = vadd.f32 %v89_v41, %v88_v33  ;;  %v96_v57 = vadd.f32 %v95_v45, %v94_v37 }
  0x40   :  { %562 = vmatprep.subr.bf16.mxu0 %v561_v1  ;;  %v67_v52 = vrot.slane %v66_v42, 1  ;;  %v73_v53 = vrot.slane %v72_v43, 1  ;;  %v79_v54 = vrot.slane %v78_v44, 1  ;;  %586 = vmatpush3.bf16.msra.mxu1 %v585_v3  ;;  %v85_v12 = vrot.slane %v84_v48, 1 }
  0x41   :  { %v56_v58 = vadd.f32 %v55_v46, %v54_v38  ;;  %v62_v60 = vadd.f32 %v61_v47, %v60_v39  ;;  %v91_v13 = vrot.slane %v90_v51, 1  ;;  %587 = vmatprep.subr.bf16.mxu1 %v677_v0  ;;  %v97_v21 = vrot.slane %v96_v57, 1 }
  0x42   :  { %v68_v19 = vadd.f32 %v67_v52, %v66_v42  ;;  %v74_v59 = vadd.f32 %v73_v53, %v72_v43  ;;  %v80_v20 = vadd.f32 %v79_v54, %v78_v44  ;;  %v86_v1 = vadd.f32 %v85_v12, %v84_v48 }
  0x43   :  { %564 = vmatpush3.bf16.msra.mxu0 %v563_v2  ;;  %v92_v22 = vadd.f32 %v91_v13, %v90_v51  ;;  %v99_v3 = vsub.f32 %v56_v58, %v785_v6  ;;  %v100_v23 = vsub.f32 %v62_v60, %v787_v7  ;;  %v98_v24 = vadd.f32 %v97_v21, %v96_v57  ;;  %v270_v13 = vld [vmem:[#allocation5 + $0x170] sm:$0xff] }
  0x44   :  { %566 = vmatprep.subr.bf16.mxu0 %v565_v4  ;;  %v101_v25 = vsub.f32 %v68_v19, %v791_v9  ;;  %v102_v26 = vsub.f32 %v74_v59, %v793_v10  ;;  %v103_v27 = vsub.f32 %v80_v20, %v795_v11  ;;  %589 = vmatpush3.bf16.msra.mxu1 %v588_v15  ;;  %v140_v2 = vrot.slane %v787_v7, 7 }
  0x45   :  { %v104_v49 = vsub.f32 %v86_v1, %v802_v16  ;;  %v105_v50 = vsub.f32 %v92_v22, %v804_v17  ;;  %v141_v55 = vrot.slane %v791_v9, 7  ;;  %v106_v56 = vsub.f32 %v98_v24, %v806_v18  ;;  %590 = vmatprep.subr.bf16.mxu1 %v677_v0 }
  0x46   :  { %v142_v4 = vrot.slane %v793_v10, 7  ;;  %v143_v28 = vrot.slane %v795_v11, 7  ;;  %v144_v29 = vrot.slane %v802_v16, 7  ;;  %v145_v63 = vrot.slane %v804_v17, 7 }
  0x47   :  { %568 = vmatpush3.bf16.msra.mxu0 %v567_v8  ;;  %v146_v5 = vrot.slane %v806_v18, 7  ;;  %v155_v15 = vsub.f32 %v99_v3, %v139_v14  ;;  %v156_v30 = vsub.f32 %v100_v23, %v140_v2  ;;  %v157_v31 = vsub.f32 %v101_v25, %v141_v55 }
  0x48   :  { %v158_v32 = vsub.f32 %v102_v26, %v142_v4  ;;  %v159_v33 = vsub.f32 %v103_v27, %v143_v28  ;;  %v160_v34 = vsub.f32 %v104_v49, %v144_v29  ;;  %v161_v35 = vsub.f32 %v105_v50, %v145_v63 }
  0x49   :  { %v162_v36 = vsub.f32 %v106_v56, %v146_v5  ;;  %v198_v0 = vrot.slane %v155_v15, 2  ;;  %v199_v37 = vrot.slane %v156_v30, 1  ;;  %v115_v8 = vrot.slane %v785_v6, 1 }
  0x4a   :  { %v201_v38 = vrot.slane %v158_v32, 7  ;;  %v203_v61 = vrot.slane %v159_v33, 6  ;;  %v205_v62 = vrot.slane %v160_v34, 5  ;;  %v207_v40 = vrot.slane %v161_v35, 4 }
  0x4b   :  { %v200_v39 = vsel %vm172_vm1, %v199_v37, %v198_v0  ;;  %v209_v41 = vrot.slane %v162_v36, 3  ;;  %v116_v14 = vrot.slane %v787_v7, 1  ;;  %v117_v44 = vrot.slane %v791_v9, 1 }
  0x4c   :  { %v202_v42 = vsel %vm176_vm2, %v201_v38, %v157_v31  ;;  %v283_v43 = vrot.slane %v200_v39, 6  ;;  %v118_v45 = vrot.slane %v793_v10, 1  ;;  %v119_v47 = vrot.slane %v795_v11, 1 }
  0x4d   :  { %v204_v46 = vsel %vm179_vm3, %v203_v61, %v202_v42  ;;  %v120_v48 = vrot.slane %v802_v16, 1  ;;  %v121_v6 = vrot.slane %v804_v17, 1  ;;  %v122_v52 = vrot.slane %v806_v18, 1  ;;  %v271_v16 = vld [vmem:[#allocation5 + $0x178] sm:$0xff] }
  0x4e   :  { %v206_v51 = vsel %vm182_vm4, %v205_v62, %v204_v46  ;;  %v131_v7 = vsub.f32 %v99_v3, %v115_v8  ;;  %v132_v53 = vsub.f32 %v100_v23, %v116_v14  ;;  %v133_v57 = vsub.f32 %v101_v25, %v117_v44  ;;  %v449_v8 = vld [vmem:[%s901_s2] ss:$0 sm:$0xff] }
  0x4f   :  { %v208_v54 = vsel %vm185_vm5, %v207_v40, %v206_v51  ;;  %v134_v9 = vsub.f32 %v102_v26, %v118_v45  ;;  %v135_v58 = vsub.f32 %v103_v27, %v119_v47  ;;  %v136_v60 = vsub.f32 %v104_v49, %v120_v48 }
  0x50   :  { %v210_v10 = vsel %vm188_vm6, %v209_v41, %v208_v54  ;;  %v137_v12 = vsub.f32 %v105_v50, %v121_v6  ;;  %v138_v11 = vsub.f32 %v106_v56, %v122_v52  ;;  %v171_v17 = vrot.slane %v132_v53, 7 }
  0x51   :  { %v284_v19 = vrot.slane %v210_v10, 6  ;;  %v174_v59 = vrot.slane %v133_v57, 6  ;;  %v175_v20 = vrot.slane %v134_v9, 5  ;;  %v178_v21 = vrot.slane %v135_v58, 4 }
  0x52   :  { %v181_v18 = vrot.slane %v136_v60, 3  ;;  %v184_v1 = vrot.slane %v137_v12, 2  ;;  %v187_v22 = vrot.slane %v138_v11, 1  ;;  %v173_v23 = vsel %vm172_vm1, %v171_v17, %v131_v7 }
  0x53   :  { %v285_v3 = vsel %vm279_vm7, %v283_v43, %v284_v19  ;;  %v177_v24 = vsel %vm176_vm2, %v175_v20, %v174_v59  ;;  %v591_v25 = vpack.c.bf16 %v271_v16, %v270_v13  ;;  %v211_v27 = vrot.slane %v131_v7, 2 }
  0x54   :  { %356 = vmatprep.mubr.f32.mxu0 %v285_v3  ;;  %v180_v26 = vsel %vm179_vm3, %v178_v21, %v177_v24  ;;  %v212_v49 = vrot.slane %v132_v53, 1  ;;  %v214_v2 = vrot.slane %v134_v9, 7  ;;  %v216_v55 = vrot.slane %v135_v58, 6 }
  0x55   :  { %v183_v50 = vsel %vm182_vm4, %v181_v18, %v180_v26  ;;  %592 = vmatpush3.bf16.msra.mxu1 %v591_v25  ;;  %v218_v56 = vrot.slane %v136_v60, 5  ;;  %v280_v28 = vrot.slane %v173_v23, 6  ;;  %v220_v29 = vrot.slane %v137_v12, 4 }
  0x56   :  { %v186_v4 = vsel %vm185_vm5, %v184_v1, %v183_v50  ;;  %v213_v5 = vsel %vm172_vm1, %v212_v49, %v211_v27  ;;  %v215_v15 = vsel %vm176_vm2, %v214_v2, %v133_v57  ;;  %v222_v30 = vrot.slane %v138_v11, 3 }
  0x57   :  { %v189_v63 = vsel %vm188_vm6, %v187_v22, %v186_v4  ;;  %v217_v32 = vsel %vm179_vm3, %v216_v55, %v215_v15  ;;  %v286_v36 = vrot.slane %v213_v5, 6 }
  0x58   :  { %v281_v31 = vrot.slane %v189_v63, 6  ;;  %v219_v33 = vsel %vm182_vm4, %v218_v56, %v217_v32 }
  0x59   :  { %v221_v35 = vsel %vm185_vm5, %v220_v29, %v219_v33 }
  0x5a   :  { %v282_v34 = vsel %vm279_vm7, %v280_v28, %v281_v31  ;;  %v223_v0 = vsel %vm188_vm6, %v222_v30, %v221_v35 }
  0x5b   :  { %357 = vmatmul.mubr.f32.vlgmr.msra.gmra.mrb[0].mxu0 %v282_v34  ;;  %v287_v37 = vrot.slane %v223_v0, 6 }
  0x5d   :  { %v288_v38 = vsel %vm279_vm7, %v286_v36, %v287_v37 }
  0x5e   :  { %535 = vmatmul.mubr.f32.vlgmr.msra.gmra.mrb[0].mxu1 %v288_v38 }
 0x12e   :  { %v482_v61 = vpop.f32.mrb[0].mxu0 }
 0x12f   :  { %v483_v62 = vpop.f32.mrb[1].mxu0 }
 0x130   :  { %v484_v39 = vadd.f32 %v483_v62, %v482_v61 }
 0x131   :  { %v428_v41 = vpop.f32.mrb[0].mxu1 }
 0x132   :  { %v359_v40 = vadd.f32 %v484_v39, %v449_v8  ;;  %v536_v14 = vpop.f32.mrb[1].mxu1 }
 0x134   :  { %v429_v42 = vadd.f32 %v428_v41, %v359_v40 }
 0x136   :  { %432 = vst [vmem:[#allocation7] sm:$0xff] %v429_v42 }
 0x137   :  { %656 = shalt.err (!%p653_p6)
}
 0x138   :  { %s657_s2 = scalar_lea.hbm %s902_s3, 128 }
 0x139   :  { %p658_p7 = scmp.ne.s32.totalorder %s902_s3, %s657_s2  ;;  %p661_p8 = scmp.lt.u32.totalorder %s657_s2, %s902_s3 }
 0x13b   :  { %p663_p9 = pnand %p661_p8, %p658_p7 }
 0x13d   :  { %666 = shalt.err (!%p663_p9)
}
 0x13e   :  { %442 = dma.vmem_to_hbm [thread:$0]  %s440_s12, 128, %s902_s3, [#allocation4]  }
 0x13f   :  { %671 = dma.done.wait [#allocation4], 128  }
 0x140   :  { %672 = vsyncadd [#allocation4], 4294967168 }
 0x141   :  { %446 = vsyncpa [#allocation3], 1 }
 0x142   :  { %447 = vsyncpa [#allocation6], 1 }
 0x143   :  { %448 = vsyncpa [#allocation4], 1 }

</bundles_post_ra>
